<compile_context>
chip_gen: v5e
topology: v5e:2x2
jax: 0.10.0
libtpu: 0.0.40
codegen_flags: <defaults>
</compile_context>

<pallas_src>
import functools

import numpy as np
import jax
import jax.numpy as jnp
from jax.experimental import pallas as pl
from jax.experimental.pallas import tpu as pltpu

_MAX_UNROLL_STRIPS = 32   # cap on statically-unrolled output-row strips


def make_kernel(k):
    k = np.asarray(k, dtype=np.float32)
    if k.ndim == 1:
        k = k[None, :] * k[:, None]
    k = k / k.sum()
    return k


def _vmem_config():
    """(per-step block budget, vmem_limit_bytes) per TPU generation."""
    budget, limit = 12 << 20, 48 << 20            # safe on v7x (64 MiB / TC)
    try:
        kind = jax.devices()[0].device_kind.lower()
        if ("v5" in kind) or ("v6" in kind):      # 128 MiB physical VMEM
            budget, limit = 24 << 20, 96 << 20
    except Exception:
        pass
    return budget, limit


def _blur_body(x_ref, o_ref, *scratch, use_scratch, cdt,
               taps_y, taps_x, taps_2d,
               src_h0, src_w0, dst_h0, dst_w0, hl, wl,
               Hp, Wp, Ho, Wo, strip):
    """FIR blur of one (B, H, W) block of planes -> (B, Ho, Wo)."""
    if use_scratch:
        scr = scratch[0]
        B = scr.shape[0]
        # Zero only the thin padding *frame*: the interior is fully
        # overwritten below on every grid step, so this stays correct even
        # when the "parallel" grid axis is sharded across TensorCores.
        if dst_h0 > 0:
            scr[:, 0:dst_h0, :] = jnp.zeros((B, dst_h0, Wp), cdt)
        if Hp - (dst_h0 + hl) > 0:
            scr[:, dst_h0 + hl:Hp, :] = jnp.zeros((B, Hp - dst_h0 - hl, Wp), cdt)
        if hl > 0 and dst_w0 > 0:
            scr[:, dst_h0:dst_h0 + hl, 0:dst_w0] = jnp.zeros((B, hl, dst_w0), cdt)
        if hl > 0 and Wp - (dst_w0 + wl) > 0:
            scr[:, dst_h0:dst_h0 + hl, dst_w0 + wl:Wp] = (
                jnp.zeros((B, hl, Wp - dst_w0 - wl), cdt))
        if hl > 0 and wl > 0:
            scr[:, dst_h0:dst_h0 + hl, dst_w0:dst_w0 + wl] = (
                x_ref[:, src_h0:src_h0 + hl, src_w0:src_w0 + wl].astype(cdt))
        rd = lambda h0, hn, w0, wn: scr[:, h0:h0 + hn, w0:w0 + wn]
        # TODO(synk): read interior tap windows directly from x_ref and only
        # the frame-crossing windows via the zeroed scratch.
    else:
        # pad <= 0 on both sides: no zero frame needed — fold the crop
        # offsets into the reads and skip the scratch copy entirely.
        rd = lambda h0, hn, w0, wn: (
            x_ref[:, src_h0 + h0:src_h0 + h0 + hn,
                  src_w0 + w0:src_w0 + w0 + wn].astype(cdt))

    # Strip-mined FIR: process `strip` output rows at a time so the
    # vertical-pass intermediate stays in vregs (no VMEM round-trip).
    for r0 in range(0, Ho, strip):
        rn = min(strip, Ho - r0)
        if taps_2d is None:
            # Separable taps: kh + kw multiply-adds per output element.
            acc = taps_y[0] * rd(r0, rn, 0, Wp)
            for ky in range(1, len(taps_y)):
                acc = acc + taps_y[ky] * rd(r0 + ky, rn, 0, Wp)
            out = taps_x[0] * acc[:, :, 0:Wo]
            for kx in range(1, len(taps_x)):
                out = out + taps_x[kx] * acc[:, :, kx:kx + Wo]
        else:
            out = None
            for ky in range(len(taps_2d)):
                for kx in range(len(taps_2d[0])):
                    term = taps_2d[ky][kx] * rd(r0 + ky, rn, kx, Wo)
                    out = term if out is None else out + term
        o_ref[:, r0:r0 + rn, :] = out.astype(o_ref.dtype)


class Blur:
    def __init__(self, kernel, pad, upsample_factor=1):
        k_in = np.asarray(kernel, dtype=np.float32)
        k2 = make_kernel(kernel)
        if upsample_factor > 1:
            k2 = k2 * (upsample_factor ** 2)
        self.kernel = jnp.asarray(k2, dtype=jnp.float32)   # buffer equivalent
        self.pad = pad
        # upfirdn2d correlates with the *flipped* taps; bake them in as
        # compile-time Python constants (no SMEM tap loads in the kernel).
        if k_in.ndim == 1:
            t = (k_in[::-1] / k_in.sum()) * float(upsample_factor)
            self._taps_y = tuple(float(v) for v in t)
            self._taps_x = self._taps_y
            self._taps_2d = None
            self._kh = self._kw = len(t)
        else:
            w2 = np.asarray(k2)[::-1, ::-1]
            self._taps_y = self._taps_x = None
            self._taps_2d = tuple(tuple(float(v) for v in row) for row in w2)
            self._kh, self._kw = w2.shape

    def __call__(self, x):
        N, C, H, W = x.shape
        kh, kw = self._kh, self._kw
        pad0, pad1 = self.pad

        Hp, Wp = H + pad0 + pad1, W + pad0 + pad1
        Ho, Wo = Hp - kh + 1, Wp - kw + 1
        src_h0 = src_w0 = max(-pad0, 0)
        dst_h0 = dst_w0 = max(pad0, 0)
        hl = H - max(-pad0, 0) - max(-pad1, 0)
        wl = W - max(-pad0, 0) - max(-pad1, 0)
        use_scratch = (pad0 > 0) or (pad1 > 0)

        NC = N * C
        dt_out = x.dtype
        cdt = jnp.bfloat16 if x.dtype == jnp.dtype(jnp.bfloat16) else jnp.float32
        in_isz = x.dtype.itemsize
        out_isz = jnp.dtype(dt_out).itemsize
        cdt_isz = jnp.dtype(cdt).itemsize

        # Output-row strip size (compile-time; bounded static unroll).
        strip = 8
        if pl.cdiv(Ho, strip) > _MAX_UNROLL_STRIPS:
            strip = pl.cdiv(pl.cdiv(Ho, _MAX_UNROLL_STRIPS), 8) * 8

        # Conservative per-plane VMEM estimate with (8,128) layout padding:
        # double-buffered in/out blocks + padded scratch + strip intermediate.
        r8 = lambda v: -(-v // 8) * 8
        r128 = lambda v: -(-v // 128) * 128
        per_plane = (2 * r8(H) * r128(W) * in_isz
                     + 2 * r8(Ho) * r128(Wo) * out_isz
                     + (r8(Hp) * r128(Wp) * cdt_isz if use_scratch else 0)
                     + r8(strip + kh) * r128(Wp) * 4)

        budget, vmem_limit = _vmem_config()
        # TODO(synk): row-tile very large planes (halo re-read via a second
        # grid axis) instead of holding a whole padded plane per grid step.
        B = max(1, min(NC, budget // per_plane))
        nsteps = pl.cdiv(NC, B)
        if nsteps > 1 and nsteps % 2 == 1:
            # Even step count: the "parallel" axis shards across v7x's 2 TCs.
            B = max(1, pl.cdiv(NC, nsteps + 1))
            nsteps = pl.cdiv(NC, B)

        if self._taps_2d is None:
            flops = 2 * NC * (kh * Ho * Wp + kw * Ho * Wo)
        else:
            flops = 2 * NC * kh * kw * Ho * Wo
        cost = pl.CostEstimate(
            flops=int(flops), transcendentals=0,
            bytes_accessed=int(NC * (H * W * in_isz + Ho * Wo * out_isz)))

        kern = functools.partial(
            _blur_body, use_scratch=use_scratch, cdt=cdt,
            taps_y=self._taps_y, taps_x=self._taps_x, taps_2d=self._taps_2d,
            src_h0=src_h0, src_w0=src_w0, dst_h0=dst_h0, dst_w0=dst_w0,
            hl=hl, wl=wl, Hp=Hp, Wp=Wp, Ho=Ho, Wo=Wo, strip=strip)
        scratch_shapes = ([pltpu.VMEM((B, Hp, Wp), cdt)] if use_scratch else [])

        # Natural (N*C, H, W) layout end-to-end: the reshape is free, there is
        # no wrapper pad/transpose/slice, and the last grid block is ragged.
        # TODO(synk): for very small W an in-kernel channels-last relayout
        # (XLU transpose) would make the output stores lane-dense.
        x_flat = x.reshape(NC, H, W)
        out = pl.pallas_call(
            kern,
            out_shape=jax.ShapeDtypeStruct((NC, Ho, Wo), dt_out),
            grid=(nsteps,),
            in_specs=[pl.BlockSpec((B, H, W), lambda i: (i, 0, 0))],
            out_specs=pl.BlockSpec((B, Ho, Wo), lambda i: (i, 0, 0)),
            scratch_shapes=scratch_shapes,
            compiler_params=pltpu.CompilerParams(
                dimension_semantics=("parallel",),
                vmem_limit_bytes=vmem_limit),
            cost_estimate=cost,
        )(x_flat)
        return out.reshape(N, C, Ho, Wo)


def _reference_blur_np(x, k, pad):
    # numpy reference of upfirdn2d(up=1, down=1, pad=pad)
    x = np.asarray(x, dtype=np.float32)
    k = np.asarray(k, dtype=np.float32)
    pad0, pad1 = pad
    xp = np.pad(x, ((0, 0), (0, 0),
                    (max(pad0, 0), max(pad1, 0)),
                    (max(pad0, 0), max(pad1, 0))))
    c0, c1 = max(-pad0, 0), max(-pad1, 0)
    xp = xp[:, :, c0:xp.shape[2] - c1, c0:xp.shape[3] - c1]
    kh, kw = k.shape
    w = k[::-1, ::-1]
    N, C, Hp, Wp = xp.shape
    Ho, Wo = Hp - kh + 1, Wp - kw + 1
    out = np.zeros((N, C, Ho, Wo), dtype=np.float32)
    for ky in range(kh):
        for kx in range(kw):
            out += w[ky, kx] * xp[:, :, ky:ky + Ho, kx:kx + Wo]
    return out


if __name__ == "__main__":
    key = jax.random.PRNGKey(0)
    x = jax.random.normal(key, (2, 4, 16, 16), dtype=jnp.float32)

    # Typical StyleGAN2 blur: separable [1,3,3,1] taps, pad=(2,1) keeps 16x16.
    blur = Blur([1, 3, 3, 1], pad=(2, 1))
    out = jax.block_until_ready(blur(x))
    ref = _reference_blur_np(np.asarray(x), np.asarray(blur.kernel), blur.pad)
    assert out.shape == ref.shape, (out.shape, ref.shape)
    np.testing.assert_allclose(np.asarray(out), ref, rtol=1e-5, atol=1e-5)

    # Non-separable (2-D taps) path.
    blur2 = Blur(np.array([[1., 2., 1.], [2., 4., 2.], [1., 2., 1.]]), pad=(1, 1))
    out2 = jax.block_until_ready(blur2(x))
    ref2 = _reference_blur_np(np.asarray(x), np.asarray(blur2.kernel), blur2.pad)
    np.testing.assert_allclose(np.asarray(out2), ref2, rtol=1e-5, atol=1e-5)

    # Negative-pad (crop) path: exercises the scratch-free branch.
    blur3 = Blur([1, 3, 3, 1], pad=(0, -1))
    out3 = jax.block_until_ready(blur3(x))
    ref3 = _reference_blur_np(np.asarray(x), np.asarray(blur3.kernel), blur3.pad)
    np.testing.assert_allclose(np.asarray(out3), ref3, rtol=1e-5, atol=1e-5)

    print("KERNEL_OK")
</pallas_src>

<mosaic_0001>
module attributes {stable_mosaic.version = 11 : i64} {
  func.func @_blur_body(%arg0: i32, %arg1: memref<8x16x16xf32, #tpu.memory_space<vmem>>, %arg2: memref<8x16x16xf32, #tpu.memory_space<vmem>>, %arg3: memref<8x19x19xf32, #tpu.memory_space<vmem>>) attributes {dimension_semantics = [#tpu.dimension_semantics<parallel>], iteration_bounds = array<i64: 1>, scalar_prefetch = 0 : i64, scratch_operands = 1 : i64, tpu.core_type = #tpu.core_type<tc>, window_params = [{transform_indices = @transform_0, window_bounds = array<i64: 8, 16, 16>}, {transform_indices = @transform_1, window_bounds = array<i64: 8, 16, 16>}]} {
    %cst = arith.constant 0.000000e+00 : f32
    %0 = vector.broadcast %cst : f32 to vector<8x2x19xf32>
    %c0 = arith.constant 0 : index
    %c0_0 = arith.constant 0 : index
    %c0_1 = arith.constant 0 : index
    %1 = vector.load %arg3[%c0, %c0_0, %c0_1] : memref<8x19x19xf32, #tpu.memory_space<vmem>>, vector<8x2x19xf32>
    tpu.vector_store %arg3[%c0, %c0_0, %c0_1], %0 {strides = array<i32>} : memref<8x19x19xf32, #tpu.memory_space<vmem>>, vector<8x2x19xf32>,
    %cst_2 = arith.constant 0.000000e+00 : f32
    %2 = vector.broadcast %cst_2 : f32 to vector<8x1x19xf32>
    %c0_3 = arith.constant 0 : index
    %c18 = arith.constant 18 : index
    %c0_4 = arith.constant 0 : index
    %3 = vector.load %arg3[%c0_3, %c18, %c0_4] : memref<8x19x19xf32, #tpu.memory_space<vmem>>, vector<8x1x19xf32>
    tpu.vector_store %arg3[%c0_3, %c18, %c0_4], %2 {strides = array<i32>} : memref<8x19x19xf32, #tpu.memory_space<vmem>>, vector<8x1x19xf32>,
    %cst_5 = arith.constant 0.000000e+00 : f32
    %4 = vector.broadcast %cst_5 : f32 to vector<8x16x2xf32>
    %c0_6 = arith.constant 0 : index
    %c2 = arith.constant 2 : index
    %c0_7 = arith.constant 0 : index
    %5 = vector.load %arg3[%c0_6, %c2, %c0_7] : memref<8x19x19xf32, #tpu.memory_space<vmem>>, vector<8x16x2xf32>
    tpu.vector_store %arg3[%c0_6, %c2, %c0_7], %4 {strides = array<i32>} : memref<8x19x19xf32, #tpu.memory_space<vmem>>, vector<8x16x2xf32>,
    %cst_8 = arith.constant 0.000000e+00 : f32
    %6 = vector.broadcast %cst_8 : f32 to vector<8x16x1xf32>
    %c0_9 = arith.constant 0 : index
    %c2_10 = arith.constant 2 : index
    %c18_11 = arith.constant 18 : index
    %7 = vector.load %arg3[%c0_9, %c2_10, %c18_11] : memref<8x19x19xf32, #tpu.memory_space<vmem>>, vector<8x16x1xf32>
    tpu.vector_store %arg3[%c0_9, %c2_10, %c18_11], %6 {strides = array<i32>} : memref<8x19x19xf32, #tpu.memory_space<vmem>>, vector<8x16x1xf32>,
    %c0_12 = arith.constant 0 : index
    %c0_13 = arith.constant 0 : index
    %c0_14 = arith.constant 0 : index
    %8 = vector.load %arg1[%c0_12, %c0_13, %c0_14] : memref<8x16x16xf32, #tpu.memory_space<vmem>>, vector<8x16x16xf32>
    %c0_15 = arith.constant 0 : index
    %c2_16 = arith.constant 2 : index
    %c2_17 = arith.constant 2 : index
    %9 = vector.load %arg3[%c0_15, %c2_16, %c2_17] : memref<8x19x19xf32, #tpu.memory_space<vmem>>, vector<8x16x16xf32>
    tpu.vector_store %arg3[%c0_15, %c2_16, %c2_17], %8 {strides = array<i32>} : memref<8x19x19xf32, #tpu.memory_space<vmem>>, vector<8x16x16xf32>,
    %c0_18 = arith.constant 0 : index
    %c0_19 = arith.constant 0 : index
    %c0_20 = arith.constant 0 : index
    %10 = vector.load %arg3[%c0_18, %c0_19, %c0_20] : memref<8x19x19xf32, #tpu.memory_space<vmem>>, vector<8x8x19xf32>
    %cst_21 = arith.constant 1.250000e-01 : f32
    %11 = vector.broadcast %cst_21 : f32 to vector<8x8x19xf32>
    %12 = arith.mulf %11, %10 : vector<8x8x19xf32>
    %c0_22 = arith.constant 0 : index
    %c1 = arith.constant 1 : index
    %c0_23 = arith.constant 0 : index
    %13 = vector.load %arg3[%c0_22, %c1, %c0_23] : memref<8x19x19xf32, #tpu.memory_space<vmem>>, vector<8x8x19xf32>
    %cst_24 = arith.constant 3.750000e-01 : f32
    %14 = vector.broadcast %cst_24 : f32 to vector<8x8x19xf32>
    %15 = arith.mulf %14, %13 : vector<8x8x19xf32>
    %16 = arith.addf %12, %15 : vector<8x8x19xf32>
    %c0_25 = arith.constant 0 : index
    %c2_26 = arith.constant 2 : index
    %c0_27 = arith.constant 0 : index
    %17 = vector.load %arg3[%c0_25, %c2_26, %c0_27] : memref<8x19x19xf32, #tpu.memory_space<vmem>>, vector<8x8x19xf32>
    %cst_28 = arith.constant 3.750000e-01 : f32
    %18 = vector.broadcast %cst_28 : f32 to vector<8x8x19xf32>
    %19 = arith.mulf %18, %17 : vector<8x8x19xf32>
    %20 = arith.addf %16, %19 : vector<8x8x19xf32>
    %c0_29 = arith.constant 0 : index
    %c3 = arith.constant 3 : index
    %c0_30 = arith.constant 0 : index
    %21 = vector.load %arg3[%c0_29, %c3, %c0_30] : memref<8x19x19xf32, #tpu.memory_space<vmem>>, vector<8x8x19xf32>
    %cst_31 = arith.constant 1.250000e-01 : f32
    %22 = vector.broadcast %cst_31 : f32 to vector<8x8x19xf32>
    %23 = arith.mulf %22, %21 : vector<8x8x19xf32>
    %24 = arith.addf %20, %23 : vector<8x8x19xf32>
    %25 = vector.extract_strided_slice %24 {offsets = [0, 0, 0], sizes = [8, 8, 16], strides = [1, 1, 1]} : vector<8x8x19xf32> to vector<8x8x16xf32>
    %cst_32 = arith.constant 1.250000e-01 : f32
    %26 = vector.broadcast %cst_32 : f32 to vector<8x8x16xf32>
    %27 = arith.mulf %26, %25 : vector<8x8x16xf32>
    %28 = vector.extract_strided_slice %24 {offsets = [0, 0, 1], sizes = [8, 8, 16], strides = [1, 1, 1]} : vector<8x8x19xf32> to vector<8x8x16xf32>
    %cst_33 = arith.constant 3.750000e-01 : f32
    %29 = vector.broadcast %cst_33 : f32 to vector<8x8x16xf32>
    %30 = arith.mulf %29, %28 : vector<8x8x16xf32>
    %31 = arith.addf %27, %30 : vector<8x8x16xf32>
    %32 = vector.extract_strided_slice %24 {offsets = [0, 0, 2], sizes = [8, 8, 16], strides = [1, 1, 1]} : vector<8x8x19xf32> to vector<8x8x16xf32>
    %cst_34 = arith.constant 3.750000e-01 : f32
    %33 = vector.broadcast %cst_34 : f32 to vector<8x8x16xf32>
    %34 = arith.mulf %33, %32 : vector<8x8x16xf32>
    %35 = arith.addf %31, %34 : vector<8x8x16xf32>
    %36 = vector.extract_strided_slice %24 {offsets = [0, 0, 3], sizes = [8, 8, 16], strides = [1, 1, 1]} : vector<8x8x19xf32> to vector<8x8x16xf32>
    %cst_35 = arith.constant 1.250000e-01 : f32
    %37 = vector.broadcast %cst_35 : f32 to vector<8x8x16xf32>
    %38 = arith.mulf %37, %36 : vector<8x8x16xf32>
    %39 = arith.addf %35, %38 : vector<8x8x16xf32>
    %c0_36 = arith.constant 0 : index
    %c0_37 = arith.constant 0 : index
    %c0_38 = arith.constant 0 : index
    %40 = vector.load %arg2[%c0_36, %c0_37, %c0_38] : memref<8x16x16xf32, #tpu.memory_space<vmem>>, vector<8x8x16xf32>
    tpu.vector_store %arg2[%c0_36, %c0_37, %c0_38], %39 {strides = array<i32>} : memref<8x16x16xf32, #tpu.memory_space<vmem>>, vector<8x8x16xf32>,
    %c0_39 = arith.constant 0 : index
    %c8 = arith.constant 8 : index
    %c0_40 = arith.constant 0 : index
    %41 = vector.load %arg3[%c0_39, %c8, %c0_40] : memref<8x19x19xf32, #tpu.memory_space<vmem>>, vector<8x8x19xf32>
    %cst_41 = arith.constant 1.250000e-01 : f32
    %42 = vector.broadcast %cst_41 : f32 to vector<8x8x19xf32>
    %43 = arith.mulf %42, %41 : vector<8x8x19xf32>
    %c0_42 = arith.constant 0 : index
    %c9 = arith.constant 9 : index
    %c0_43 = arith.constant 0 : index
    %44 = vector.load %arg3[%c0_42, %c9, %c0_43] : memref<8x19x19xf32, #tpu.memory_space<vmem>>, vector<8x8x19xf32>
    %cst_44 = arith.constant 3.750000e-01 : f32
    %45 = vector.broadcast %cst_44 : f32 to vector<8x8x19xf32>
    %46 = arith.mulf %45, %44 : vector<8x8x19xf32>
    %47 = arith.addf %43, %46 : vector<8x8x19xf32>
    %c0_45 = arith.constant 0 : index
    %c10 = arith.constant 10 : index
    %c0_46 = arith.constant 0 : index
    %48 = vector.load %arg3[%c0_45, %c10, %c0_46] : memref<8x19x19xf32, #tpu.memory_space<vmem>>, vector<8x8x19xf32>
    %cst_47 = arith.constant 3.750000e-01 : f32
    %49 = vector.broadcast %cst_47 : f32 to vector<8x8x19xf32>
    %50 = arith.mulf %49, %48 : vector<8x8x19xf32>
    %51 = arith.addf %47, %50 : vector<8x8x19xf32>
    %c0_48 = arith.constant 0 : index
    %c11 = arith.constant 11 : index
    %c0_49 = arith.constant 0 : index
    %52 = vector.load %arg3[%c0_48, %c11, %c0_49] : memref<8x19x19xf32, #tpu.memory_space<vmem>>, vector<8x8x19xf32>
    %cst_50 = arith.constant 1.250000e-01 : f32
    %53 = vector.broadcast %cst_50 : f32 to vector<8x8x19xf32>
    %54 = arith.mulf %53, %52 : vector<8x8x19xf32>
    %55 = arith.addf %51, %54 : vector<8x8x19xf32>
    %56 = vector.extract_strided_slice %55 {offsets = [0, 0, 0], sizes = [8, 8, 16], strides = [1, 1, 1]} : vector<8x8x19xf32> to vector<8x8x16xf32>
    %cst_51 = arith.constant 1.250000e-01 : f32
    %57 = vector.broadcast %cst_51 : f32 to vector<8x8x16xf32>
    %58 = arith.mulf %57, %56 : vector<8x8x16xf32>
    %59 = vector.extract_strided_slice %55 {offsets = [0, 0, 1], sizes = [8, 8, 16], strides = [1, 1, 1]} : vector<8x8x19xf32> to vector<8x8x16xf32>
    %cst_52 = arith.constant 3.750000e-01 : f32
    %60 = vector.broadcast %cst_52 : f32 to vector<8x8x16xf32>
    %61 = arith.mulf %60, %59 : vector<8x8x16xf32>
    %62 = arith.addf %58, %61 : vector<8x8x16xf32>
    %63 = vector.extract_strided_slice %55 {offsets = [0, 0, 2], sizes = [8, 8, 16], strides = [1, 1, 1]} : vector<8x8x19xf32> to vector<8x8x16xf32>
    %cst_53 = arith.constant 3.750000e-01 : f32
    %64 = vector.broadcast %cst_53 : f32 to vector<8x8x16xf32>
    %65 = arith.mulf %64, %63 : vector<8x8x16xf32>
    %66 = arith.addf %62, %65 : vector<8x8x16xf32>
    %67 = vector.extract_strided_slice %55 {offsets = [0, 0, 3], sizes = [8, 8, 16], strides = [1, 1, 1]} : vector<8x8x19xf32> to vector<8x8x16xf32>
    %cst_54 = arith.constant 1.250000e-01 : f32
    %68 = vector.broadcast %cst_54 : f32 to vector<8x8x16xf32>
    %69 = arith.mulf %68, %67 : vector<8x8x16xf32>
    %70 = arith.addf %66, %69 : vector<8x8x16xf32>
    %c0_55 = arith.constant 0 : index
    %c8_56 = arith.constant 8 : index
    %c0_57 = arith.constant 0 : index
    %71 = vector.load %arg2[%c0_55, %c8_56, %c0_57] : memref<8x16x16xf32, #tpu.memory_space<vmem>>, vector<8x8x16xf32>
    tpu.vector_store %arg2[%c0_55, %c8_56, %c0_57], %70 {strides = array<i32>} : memref<8x16x16xf32, #tpu.memory_space<vmem>>, vector<8x8x16xf32>,
    return
  }
  func.func @transform_0(%arg0: i32) -> (i32, i32, i32) {
    %c0_i32 = arith.constant 0 : i32
    %c0_i32_0 = arith.constant 0 : i32
    %c0_i32_1 = arith.constant 0 : i32
    return %arg0, %c0_i32, %c0_i32_0 : i32, i32, i32
  }
  func.func @transform_1(%arg0: i32) -> (i32, i32, i32) {
    %c0_i32 = arith.constant 0 : i32
    %c0_i32_0 = arith.constant 0 : i32
    %c0_i32_1 = arith.constant 0 : i32
    return %arg0, %c0_i32, %c0_i32_0 : i32, i32, i32
  }
}

</mosaic_0001>

<bundles_post_ra>
// kernel: tpu_custom_call.1
= control target key start
LH: loop header
LB: loop body
LE: loop exit
PB: predicated region body
PF: predicated region fallthrough
CT: control target
= control target key end

     0   :  { %6 = vsyncpa [#allocation4], 0  ;;  %s1026_s0 = inlined_call_operand.hbm [shape: f32[8,16,16], index: 0, kind: input, shape index: {}]   ;;  %s1027_s1 = inlined_call_operand.hbm [shape: f32[8,16,16], index: 1, kind: output, shape index: {}]  }
   0x1   :  { %7 = vsyncpa [#allocation5], 0  ;;  %s12_s8 = sshll.u32 %s1026_s0, 4  ;;  %s703_s9 = smov [#allocation3]   ;;  %s13_s8 = int_to_ptr.hbm [resolvable:$true] %s12_s8 }
   0x2   :  { %s14_s10 = sshll.u32 %s703_s9, 4  ;;  %s704_s11 = smov 128   ;;  %s15_s10 = int_to_ptr.vmem [resolvable:$true] %s14_s10 }
   0x3   :  { %s705_s12 = smov 8  }
   0x4   :  { %20 = dma.hbm_to_vmem [thread:$0]  %s13_s8, 2048, %s15_s10, [#allocation4], %s704_s11, %s704_s11, %s705_s12  }
   0x5   :  { %699 = dma.done.wait [#allocation4], 2048  }
   0x6   :  { %700 = vsyncadd [#allocation4], 4294965248  ;;  %v81_v0 = vld [vmem:[#allocation3 + $0x20] sm:$0xff]  ;;  %v79_v1 = vld [vmem:[#allocation3 + $0x10] sm:$0xff]  ;;  %s706_s13 = smov 2   ;;  %vm43_vm0 = vcmask 15360  }
   0x7   :  { %v77_v2 = vld [vmem:[#allocation3] sm:$0xff]  ;;  %117 = vrot.lane.b32.xlu2 %v81_v0, %s706_s13  ;;  %113 = vrot.lane.b32.xlu1 %v79_v1, %s706_s13  ;;  %v82_v3 = vld [vmem:[#allocation3 + $0x28] sm:$0xff]  ;;  %v80_v4 = vld [vmem:[#allocation3 + $0x18] sm:$0xff]  ;;  %vm60_vm1 = vcmask 154768   ;;  %v707_v6 = vmov 0.0   ;;  %vm25_vm2 = vcmask 148480  }
   0x8   :  { %109 = vrot.lane.b32.xlu0 %v77_v2, %s706_s13  ;;  %v78_v5 = vld [vmem:[#allocation3 + $0x8] sm:$0xff]  ;;  %48 = vst.msk [vmem:[#allocation2 + $0x32] sm:$0xff] %vm43_vm0, %v707_v6  ;;  %v84_v7 = vld [vmem:[#allocation3 + $0x38] sm:$0xff]  ;;  %v85_v8 = vld [vmem:[#allocation3 + $0x40] sm:$0xff]  ;;  %vm157_vm3 = vcmask 146448   ;;  %vm34_vm4 = vcmask 147456  }
   0x9   :  { %65 = vst.msk [vmem:[#allocation2 + $0x32] sm:$0xff] %vm60_vm1, %v707_v6  ;;  %v83_v9 = vld [vmem:[#allocation3 + $0x30] sm:$0xff]  ;;  %v88_v11 = vld [vmem:[#allocation3 + $0x58] sm:$0xff]  ;;  %v86_v12 = vld [vmem:[#allocation3 + $0x48] sm:$0xff]  ;;  %s708_s0 = smov 127   ;;  %s709_s14 = smov 126  }
   0xa   :  { %44 = vst.msk [vmem:[#allocation2 + $0x2] sm:$0xff] %vm43_vm0, %v707_v6  ;;  %v87_v10 = vld [vmem:[#allocation3 + $0x50] sm:$0xff]  ;;  %v90_v13 = vld [vmem:[#allocation3 + $0x68] sm:$0xff]  ;;  %v89_v15 = vld [vmem:[#allocation3 + $0x60] sm:$0xff]  ;;  %s710_s15 = smov 125   ;;  %vm390_vm5 = vcmask 130048  }
   0xb   :  { %45 = vst.msk [vmem:[#allocation2 + $0xa] sm:$0xff] %vm43_vm0, %v707_v6  ;;  %v91_v14 = vld [vmem:[#allocation3 + $0x70] sm:$0xff]  ;;  %v92_v16 = vld [vmem:[#allocation3 + $0x78] sm:$0xff]  ;;  %s711_s16 = smov [#allocation6]   ;;  %s629_s20 = sshll.u32 %s1027_s1, 4  ;;  %s630_s20 = int_to_ptr.hbm [resolvable:$true] %s629_s20 }
   0xc   :  { %46 = vst.msk [vmem:[#allocation2 + $0x1a] sm:$0xff] %vm43_vm0, %v707_v6  ;;  %s627_s17 = sshll.u32 %s711_s16, 4  ;;  %s628_s17 = int_to_ptr.vmem [resolvable:$true] %s627_s17 }
   0xd   :  { %47 = vst.msk [vmem:[#allocation2 + $0x22] sm:$0xff] %vm43_vm0, %v707_v6 }
   0xe   :  { %49 = vst.msk [vmem:[#allocation2 + $0x3a] sm:$0xff] %vm43_vm0, %v707_v6 }
   0xf   :  { %119 = vrot.lane.b32.xlu2 %v82_v3, %s706_s13  ;;  %115 = vrot.lane.b32.xlu1 %v80_v4, %s706_s13  ;;  %50 = vst.msk [vmem:[#allocation2 + $0x4a] sm:$0xff] %vm43_vm0, %v707_v6 }
  0x10   :  { %111 = vrot.lane.b32.xlu0 %v78_v5, %s706_s13  ;;  %51 = vst.msk [vmem:[#allocation2 + $0x52] sm:$0xff] %vm43_vm0, %v707_v6 }
  0x11   :  { %52 = vst.msk [vmem:[#allocation2 + $0x62] sm:$0xff] %vm43_vm0, %v707_v6 }
  0x12   :  { %53 = vst.msk [vmem:[#allocation2 + $0x6a] sm:$0xff] %vm43_vm0, %v707_v6 }
  0x13   :  { %54 = vst.msk [vmem:[#allocation2 + $0x7a] sm:$0xff] %vm43_vm0, %v707_v6 }
  0x14   :  { %55 = vst.msk [vmem:[#allocation2 + $0x82] sm:$0xff] %vm43_vm0, %v707_v6 }
  0x15   :  { %56 = vst.msk [vmem:[#allocation2 + $0x92] sm:$0xff] %vm43_vm0, %v707_v6 }
  0x16   :  { %57 = vst.msk [vmem:[#allocation2 + $0x9a] sm:$0xff] %vm43_vm0, %v707_v6 }
  0x17   :  { %123 = vrot.lane.b32.xlu1 %v84_v7, %s706_s13  ;;  %125 = vrot.lane.b32.xlu2 %v85_v8, %s706_s13  ;;  %58 = vst.msk [vmem:[#allocation2 + $0xaa] sm:$0xff] %vm43_vm0, %v707_v6 }
  0x18   :  { %121 = vrot.lane.b32.xlu0 %v83_v9, %s706_s13  ;;  %59 = vst.msk [vmem:[#allocation2 + $0xb2] sm:$0xff] %vm43_vm0, %v707_v6 }
  0x19   :  { %66 = vst.msk [vmem:[#allocation2 + $0x3a] sm:$0xff] %vm60_vm1, %v707_v6 }
  0x1a   :  { %61 = vst.msk [vmem:[#allocation2 + $0x2] sm:$0xff] %vm60_vm1, %v707_v6 }
  0x1b   :  { %62 = vst.msk [vmem:[#allocation2 + $0xa] sm:$0xff] %vm60_vm1, %v707_v6 }
  0x1c   :  { %63 = vst.msk [vmem:[#allocation2 + $0x1a] sm:$0xff] %vm60_vm1, %v707_v6 }
  0x1d   :  { %64 = vst.msk [vmem:[#allocation2 + $0x22] sm:$0xff] %vm60_vm1, %v707_v6 }
  0x1e   :  { %67 = vst.msk [vmem:[#allocation2 + $0x4a] sm:$0xff] %vm60_vm1, %v707_v6 }
  0x1f   :  { %129 = vrot.lane.b32.xlu1 %v87_v10, %s706_s13  ;;  %131 = vrot.lane.b32.xlu2 %v88_v11, %s706_s13  ;;  %68 = vst.msk [vmem:[#allocation2 + $0x52] sm:$0xff] %vm60_vm1, %v707_v6 }
  0x20   :  { %127 = vrot.lane.b32.xlu0 %v86_v12, %s706_s13  ;;  %69 = vst.msk [vmem:[#allocation2 + $0x62] sm:$0xff] %vm60_vm1, %v707_v6 }
  0x21   :  { %70 = vst.msk [vmem:[#allocation2 + $0x6a] sm:$0xff] %vm60_vm1, %v707_v6 }
  0x22   :  { %71 = vst.msk [vmem:[#allocation2 + $0x7a] sm:$0xff] %vm60_vm1, %v707_v6 }
  0x23   :  { %72 = vst.msk [vmem:[#allocation2 + $0x82] sm:$0xff] %vm60_vm1, %v707_v6 }
  0x24   :  { %73 = vst.msk [vmem:[#allocation2 + $0x92] sm:$0xff] %vm60_vm1, %v707_v6 }
  0x25   :  { %74 = vst.msk [vmem:[#allocation2 + $0x9a] sm:$0xff] %vm60_vm1, %v707_v6 }
  0x26   :  { %75 = vst.msk [vmem:[#allocation2 + $0xaa] sm:$0xff] %vm60_vm1, %v707_v6 }
  0x27   :  { %135 = vrot.lane.b32.xlu1 %v90_v13, %s706_s13  ;;  %137 = vrot.lane.b32.xlu2 %v91_v14, %s706_s13  ;;  %76 = vst.msk [vmem:[#allocation2 + $0xb2] sm:$0xff] %vm60_vm1, %v707_v6 }
  0x28   :  { %133 = vrot.lane.b32.xlu0 %v89_v15, %s706_s13  ;;  %28 = vst.msk [vmem:[#allocation2 + $0x30] sm:$0x3] %vm25_vm2, %v707_v6 }
  0x29   :  { %26 = vst.msk [vmem:[#allocation2] sm:$0x3] %vm25_vm2, %v707_v6 }
  0x2a   :  { %27 = vst.msk [vmem:[#allocation2 + $0x18] sm:$0x3] %vm25_vm2, %v707_v6 }
  0x2b   :  { %29 = vst.msk [vmem:[#allocation2 + $0x48] sm:$0x3] %vm25_vm2, %v707_v6 }
  0x2c   :  { %30 = vst.msk [vmem:[#allocation2 + $0x60] sm:$0x3] %vm25_vm2, %v707_v6 }
  0x2d   :  { %31 = vst.msk [vmem:[#allocation2 + $0x78] sm:$0x3] %vm25_vm2, %v707_v6 }
  0x2e   :  { %32 = vst.msk [vmem:[#allocation2 + $0x90] sm:$0x3] %vm25_vm2, %v707_v6 }
  0x2f   :  { %33 = vst.msk [vmem:[#allocation2 + $0xa8] sm:$0x3] %vm25_vm2, %v707_v6 }
  0x30   :  { %139 = vrot.lane.b32.xlu0 %v92_v16, %s706_s13  ;;  %37 = vst.msk [vmem:[#allocation2 + $0x42] sm:$0x1] %vm34_vm4, %v707_v6 }
  0x31   :  { %35 = vst.msk [vmem:[#allocation2 + $0x12] sm:$0x1] %vm34_vm4, %v707_v6 }
  0x32   :  { %36 = vst.msk [vmem:[#allocation2 + $0x2a] sm:$0x1] %vm34_vm4, %v707_v6 }
  0x33   :  { %38 = vst.msk [vmem:[#allocation2 + $0x5a] sm:$0x1] %vm34_vm4, %v707_v6 }
  0x34   :  { %39 = vst.msk [vmem:[#allocation2 + $0x72] sm:$0x1] %vm34_vm4, %v707_v6 }
  0x35   :  { %40 = vst.msk [vmem:[#allocation2 + $0x8a] sm:$0x1] %vm34_vm4, %v707_v6 }
  0x36   :  { %41 = vst.msk [vmem:[#allocation2 + $0xa2] sm:$0x1] %vm34_vm4, %v707_v6 }
  0x37   :  { %42 = vst.msk [vmem:[#allocation2 + $0xba] sm:$0x1] %vm34_vm4, %v707_v6 }
  0x61   :  { %v118_v17 = vpop.permute.xlu2 %117 }
  0x62   :  { %162 = vst.msk [vmem:[#allocation2 + $0x32] sm:$0xff] %vm157_vm3, %v118_v17 }
  0x69   :  { %v120_v18 = vpop.permute.xlu2 %119  ;;  %v176_v19 = vld [vmem:[#allocation2 + $0x30] sm:$0xff] }
  0x6a   :  { %v192_v20 = vld [vmem:[#allocation2 + $0x31] sm:$0xff]  ;;  %163 = vst.msk [vmem:[#allocation2 + $0x3a] sm:$0xff] %vm157_vm3, %v120_v18  ;;  %v184_v22 = vmul.f32 0.125, %v176_v19 }
  0x6b   :  { %v216_v21 = vld [vmem:[#allocation2 + $0x32] sm:$0xff]  ;;  %v200_v23 = vmul.f32 0.375, %v192_v20 }
  0x6c   :  { %v224_v25 = vmul.f32 0.375, %v216_v21 }
  0x6d   :  { %v208_v24 = vadd.f32 %v200_v23, %v184_v22 }
  0x6f   :  { %v232_v26 = vadd.f32 %v224_v25, %v208_v24 }
  0x71   :  { %v240_v27 = vld [vmem:[#allocation2 + $0x33] sm:$0xff]  ;;  %v126_v28 = vpop.permute.xlu2 %125 }
  0x72   :  { %v248_v29 = vmul.f32 0.125, %v240_v27  ;;  %166 = vst.msk [vmem:[#allocation2 + $0x62] sm:$0xff] %vm157_vm3, %v126_v28 }
  0x74   :  { %v835_v30 = vadd.f32 %v248_v29, %v232_v26 }
  0x76   :  { %v838_v31 = vmul.f32 0.375, %v835_v30 }
  0x78   :  { %290 = vrot.lane.b32.xlu0 %v838_v31, %s708_s0 }
  0x79   :  { %v114_v32 = vpop.permute.xlu1 %113  ;;  %v132_v33 = vpop.permute.xlu2 %131  ;;  %v178_v0 = vld [vmem:[#allocation2 + $0x60] sm:$0xff] }
  0x7a   :  { %160 = vst.msk [vmem:[#allocation2 + $0x1a] sm:$0xff] %vm157_vm3, %v114_v32  ;;  %v110_v34 = vpop.permute.xlu0 %109  ;;  %v194_v1 = vld [vmem:[#allocation2 + $0x61] sm:$0xff]  ;;  %v186_v9 = vmul.f32 0.125, %v178_v0 }
  0x7b   :  { %158 = vst.msk [vmem:[#allocation2 + $0x2] sm:$0xff] %vm157_vm3, %v110_v34  ;;  %v202_v10 = vmul.f32 0.375, %v194_v1  ;;  %v218_v12 = vld [vmem:[#allocation2 + $0x62] sm:$0xff] }
  0x7c   :  { %169 = vst.msk [vmem:[#allocation2 + $0x82] sm:$0xff] %vm157_vm3, %v132_v33  ;;  %v226_v18 = vmul.f32 0.375, %v218_v12  ;;  %v441_v12 = vld [vmem:[#allocation2 + $0x3a] sm:$0xff] }
  0x7d   :  { %v210_v17 = vadd.f32 %v202_v10, %v186_v9 }
  0x7f   :  { %v234_v29 = vadd.f32 %v226_v18, %v210_v17  ;;  %v449_v18 = vmul.f32 0.375, %v441_v12 }
  0x81   :  { %v116_v35 = vpop.permute.xlu1 %115  ;;  %v175_v36 = vld [vmem:[#allocation2 + $0x18] sm:$0xff]  ;;  %v138_v38 = vpop.permute.xlu2 %137 }
  0x82   :  { %v191_v37 = vld [vmem:[#allocation2 + $0x19] sm:$0xff]  ;;  %161 = vst.msk [vmem:[#allocation2 + $0x22] sm:$0xff] %vm157_vm3, %v116_v35  ;;  %v112_v39 = vpop.permute.xlu0 %111  ;;  %v183_v40 = vmul.f32 0.125, %v175_v36  ;;  %v190_v43 = vld [vmem:[#allocation2 + $0x1] sm:$0xff] }
  0x83   :  { %v199_v41 = vmul.f32 0.375, %v191_v37  ;;  %v174_v42 = vld [vmem:[#allocation2] sm:$0xff]  ;;  %159 = vst.msk [vmem:[#allocation2 + $0xa] sm:$0xff] %vm157_vm3, %v112_v39  ;;  %v198_v45 = vmul.f32 0.375, %v190_v43 }
  0x84   :  { %v182_v44 = vmul.f32 0.125, %v174_v42  ;;  %172 = vst.msk [vmem:[#allocation2 + $0xaa] sm:$0xff] %vm157_vm3, %v138_v38  ;;  %v215_v46 = vld [vmem:[#allocation2 + $0x1a] sm:$0xff]  ;;  %v214_v48 = vld [vmem:[#allocation2 + $0x2] sm:$0xff] }
  0x85   :  { %v207_v47 = vadd.f32 %v199_v41, %v183_v40  ;;  %v223_v50 = vmul.f32 0.375, %v215_v46  ;;  %v222_v53 = vmul.f32 0.375, %v214_v48 }
  0x86   :  { %v206_v49 = vadd.f32 %v198_v45, %v182_v44 }
  0x87   :  { %v231_v55 = vadd.f32 %v223_v50, %v207_v47 }
  0x88   :  { %v230_v58 = vadd.f32 %v222_v53, %v206_v49 }
  0x89   :  { %v124_v51 = vpop.permute.xlu1 %123  ;;  %v239_v52 = vld [vmem:[#allocation2 + $0x1b] sm:$0xff] }
  0x8a   :  { %165 = vst.msk [vmem:[#allocation2 + $0x52] sm:$0xff] %vm157_vm3, %v124_v51  ;;  %v122_v54 = vpop.permute.xlu0 %121  ;;  %v247_v56 = vmul.f32 0.125, %v239_v52  ;;  %v238_v57 = vld [vmem:[#allocation2 + $0x3] sm:$0xff] }
  0x8b   :  { %164 = vst.msk [vmem:[#allocation2 + $0x4a] sm:$0xff] %vm157_vm3, %v122_v54  ;;  %v246_v59 = vmul.f32 0.125, %v238_v57  ;;  %v181_v39 = vld [vmem:[#allocation2 + $0xa8] sm:$0xff] }
  0x8c   :  { %v850_v60 = vadd.f32 %v247_v56, %v231_v55  ;;  %v197_v40 = vld [vmem:[#allocation2 + $0xa9] sm:$0xff]  ;;  %v189_v43 = vmul.f32 0.125, %v181_v39 }
  0x8d   :  { %v852_v61 = vadd.f32 %v246_v59, %v230_v58  ;;  %v205_v44 = vmul.f32 0.375, %v197_v40  ;;  %v221_v45 = vld [vmem:[#allocation2 + $0xaa] sm:$0xff] }
  0x8e   :  { %v855_v62 = vmul.f32 0.375, %v850_v60  ;;  %v229_v57 = vmul.f32 0.375, %v221_v45  ;;  %v415_v9 = vld [vmem:[#allocation2 + $0x9] sm:$0xff] }
  0x8f   :  { %v858_v63 = vmul.f32 0.375, %v852_v61  ;;  %v213_v56 = vadd.f32 %v205_v44, %v189_v43  ;;  %v423_v17 = vmul.f32 0.375, %v415_v9 }
  0x90   :  { %288 = vrot.lane.b32.xlu2 %v855_v62, %s708_s0 }
  0x91   :  { %286 = vrot.lane.b32.xlu1 %v858_v63, %s708_s0  ;;  %v130_v2 = vpop.permute.xlu1 %129  ;;  %v237_v1 = vadd.f32 %v229_v57, %v213_v56 }
  0x92   :  { %168 = vst.msk [vmem:[#allocation2 + $0x7a] sm:$0xff] %vm157_vm3, %v130_v2  ;;  %v128_v3 = vpop.permute.xlu0 %127  ;;  %v177_v4 = vld [vmem:[#allocation2 + $0x48] sm:$0xff] }
  0x93   :  { %v193_v5 = vld [vmem:[#allocation2 + $0x49] sm:$0xff]  ;;  %167 = vst.msk [vmem:[#allocation2 + $0x6a] sm:$0xff] %vm157_vm3, %v128_v3  ;;  %v185_v7 = vmul.f32 0.125, %v177_v4 }
  0x94   :  { %v217_v6 = vld [vmem:[#allocation2 + $0x4a] sm:$0xff]  ;;  %v201_v8 = vmul.f32 0.375, %v193_v5 }
  0x95   :  { %v241_v11 = vld [vmem:[#allocation2 + $0x4b] sm:$0xff]  ;;  %v225_v14 = vmul.f32 0.375, %v217_v6 }
  0x96   :  { %v209_v13 = vadd.f32 %v201_v8, %v185_v7  ;;  %v249_v16 = vmul.f32 0.125, %v241_v11  ;;  %v401_v7 = vld [vmem:[#allocation2 + $0x38] sm:$0xff]  ;;  %v900_v8 = vmul.f32 0.125, %v852_v61 }
  0x97   :  { %v409_v10 = vmul.f32 0.125, %v401_v7  ;;  %v466_v7 = vld [vmem:[#allocation2 + $0x53] sm:$0xff] }
  0x98   :  { %v233_v15 = vadd.f32 %v225_v14, %v209_v13  ;;  %v400_v13 = vld [vmem:[#allocation2 + $0x20] sm:$0xff] }
  0x99   :  { %v136_v19 = vpop.permute.xlu1 %135  ;;  %v179_v21 = vld [vmem:[#allocation2 + $0x78] sm:$0xff]  ;;  %v416_v14 = vld [vmem:[#allocation2 + $0x21] sm:$0xff] }
  0x9a   :  { %v866_v20 = vadd.f32 %v249_v16, %v233_v15  ;;  %v195_v22 = vld [vmem:[#allocation2 + $0x79] sm:$0xff]  ;;  %171 = vst.msk [vmem:[#allocation2 + $0x9a] sm:$0xff] %vm157_vm3, %v136_v19  ;;  %v134_v24 = vpop.permute.xlu0 %133  ;;  %v242_v25 = vld [vmem:[#allocation2 + $0x63] sm:$0xff]  ;;  %v187_v26 = vmul.f32 0.125, %v179_v21  ;;  %v907_v15 = vmul.f32 0.125, %v835_v30  ;;  %v408_v21 = vmul.f32 0.125, %v400_v13 }
  0x9b   :  { %v219_v23 = vld [vmem:[#allocation2 + $0x7a] sm:$0xff]  ;;  %v203_v27 = vmul.f32 0.375, %v195_v22  ;;  %170 = vst.msk [vmem:[#allocation2 + $0x92] sm:$0xff] %vm157_vm3, %v134_v24  ;;  %v250_v32 = vmul.f32 0.125, %v242_v25  ;;  %v424_v22 = vmul.f32 0.375, %v416_v14  ;;  %v402_v24 = vld [vmem:[#allocation2 + $0x50] sm:$0xff] }
  0x9c   :  { %v273_v28 = vmul.f32 0.375, %v866_v20  ;;  %v243_v33 = vld [vmem:[#allocation2 + $0x7b] sm:$0xff]  ;;  %v227_v35 = vmul.f32 0.375, %v219_v23  ;;  %v439_v23 = vld [vmem:[#allocation2 + $0xa] sm:$0xff]  ;;  %v914_v25 = vmul.f32 0.125, %v866_v20  ;;  %v474_v14 = vmul.f32 0.125, %v466_v7 }
  0x9d   :  { %v211_v34 = vadd.f32 %v203_v27, %v187_v26  ;;  %v258_v36 = vadd.f32 %v250_v32, %v234_v29  ;;  %v251_v38 = vmul.f32 0.125, %v243_v33  ;;  %v465_v19 = vld [vmem:[#allocation2 + $0x3b] sm:$0xff] }
  0x9e   :  { %292 = vrot.lane.b32.xlu1 %v273_v28, %s708_s0  ;;  %v404_v26 = vld [vmem:[#allocation2 + $0x80] sm:$0xff]  ;;  %v473_v29 = vmul.f32 0.125, %v465_v19  ;;  %v467_v19 = vld [vmem:[#allocation2 + $0x6b] sm:$0xff] }
  0x9f   :  { %v235_v37 = vadd.f32 %v227_v35, %v211_v34  ;;  %v274_v41 = vmul.f32 0.375, %v258_v36  ;;  %v420_v27 = vld [vmem:[#allocation2 + $0x81] sm:$0xff]  ;;  %v447_v34 = vmul.f32 0.375, %v439_v23  ;;  %v432_v35 = vadd.f32 %v424_v22, %v408_v21 }
  0xa0   :  { %v440_v32 = vld [vmem:[#allocation2 + $0x22] sm:$0xff]  ;;  %v412_v39 = vmul.f32 0.125, %v404_v26  ;;  %v428_v40 = vmul.f32 0.375, %v420_v27 }
  0xa1   :  { %v872_v42 = vadd.f32 %v251_v38, %v235_v37  ;;  %294 = vrot.lane.b32.xlu2 %v274_v41, %s708_s0  ;;  %v463_v38 = vld [vmem:[#allocation2 + $0xb] sm:$0xff]  ;;  %v444_v20 = vld [vmem:[#allocation2 + $0x82] sm:$0xff]  ;;  %v448_v45 = vmul.f32 0.375, %v440_v32 }
  0xa2   :  { %v140_v46 = vpop.permute.xlu0 %139  ;;  %v180_v48 = vld [vmem:[#allocation2 + $0x90] sm:$0xff]  ;;  %v469_v32 = vld [vmem:[#allocation2 + $0x9b] sm:$0xff] }
  0xa3   :  { %v275_v47 = vmul.f32 0.375, %v872_v42  ;;  %v196_v49 = vld [vmem:[#allocation2 + $0x91] sm:$0xff]  ;;  %173 = vst.msk [vmem:[#allocation2 + $0xb2] sm:$0xff] %vm157_vm3, %v140_v46  ;;  %v188_v51 = vmul.f32 0.125, %v180_v48  ;;  %v921_v43 = vmul.f32 0.125, %v872_v42  ;;  %v403_v46 = vld [vmem:[#allocation2 + $0x68] sm:$0xff] }
  0xa4   :  { %v220_v50 = vld [vmem:[#allocation2 + $0x92] sm:$0xff]  ;;  %v204_v52 = vmul.f32 0.375, %v196_v49  ;;  %v471_v49 = vmul.f32 0.125, %v463_v38  ;;  %v468_v42 = vld [vmem:[#allocation2 + $0x83] sm:$0xff]  ;;  %v411_v56 = vmul.f32 0.125, %v403_v46 }
  0xa5   :  { %296 = vrot.lane.b32.xlu0 %v275_v47, %s708_s0  ;;  %v244_v53 = vld [vmem:[#allocation2 + $0x93] sm:$0xff]  ;;  %v228_v55 = vmul.f32 0.375, %v220_v50  ;;  %v456_v50 = vadd.f32 %v448_v45, %v432_v35 }
  0xa6   :  { %v212_v54 = vadd.f32 %v204_v52, %v188_v51  ;;  %v252_v59 = vmul.f32 0.125, %v244_v53  ;;  %v464_v51 = vld [vmem:[#allocation2 + $0x23] sm:$0xff]  ;;  %v452_v52 = vmul.f32 0.375, %v444_v20  ;;  %v442_v53 = vld [vmem:[#allocation2 + $0x52] sm:$0xff] }
  0xa8   :  { %v236_v58 = vadd.f32 %v228_v55, %v212_v54  ;;  %v436_v54 = vadd.f32 %v428_v40, %v412_v39  ;;  %v477_v39 = vmul.f32 0.125, %v469_v32 }
  0xaa   :  { %v878_v0 = vadd.f32 %v252_v59, %v236_v58  ;;  %v245_v2 = vld [vmem:[#allocation2 + $0xab] sm:$0xff]  ;;  %v460_v9 = vadd.f32 %v452_v52, %v436_v54 }
  0xab   :  { %v253_v4 = vmul.f32 0.125, %v245_v2  ;;  %v450_v2 = vmul.f32 0.375, %v442_v53 }
  0xac   :  { %v276_v3 = vmul.f32 0.375, %v878_v0  ;;  %v930_v58 = vmul.f32 0.125, %v878_v0 }
  0xad   :  { %318 = vrot.lane.b32.xlu0 %v858_v63, %s709_s14  ;;  %v261_v5 = vadd.f32 %v253_v4, %v237_v1  ;;  %v894_v63 = vmul.f32 0.125, %v850_v60  ;;  %v904_v60 = vmul.f32 0.125, %v258_v36  ;;  %v410_v36 = vmul.f32 0.125, %v402_v24  ;;  %v421_v4 = vld [vmem:[#allocation2 + $0x99] sm:$0xff] }
  0xae   :  { %298 = vrot.lane.b32.xlu1 %v276_v3, %s708_s0  ;;  %v472_v1 = vmul.f32 0.125, %v464_v51  ;;  %v429_v13 = vmul.f32 0.375, %v421_v4 }
  0xaf   :  { %v277_v6 = vmul.f32 0.375, %v261_v5  ;;  %v918_v37 = vmul.f32 0.125, %v261_v5 }
  0xb1   :  { %300 = vrot.lane.b32.xlu2 %v277_v6, %s708_s0 }
  0xb5   :  { %324 = vrot.lane.b32.xlu0 %v273_v28, %s709_s14  ;;  %v418_v28 = vld [vmem:[#allocation2 + $0x51] sm:$0xff] }
  0xb6   :  { %320 = vrot.lane.b32.xlu1 %v855_v62, %s709_s14  ;;  %v417_v62 = vld [vmem:[#allocation2 + $0x39] sm:$0xff] }
  0xb7   :  { %v425_v11 = vmul.f32 0.375, %v417_v62  ;;  %v443_v62 = vld [vmem:[#allocation2 + $0x6a] sm:$0xff] }
  0xb9   :  { %322 = vrot.lane.b32.xlu2 %v838_v31, %s709_s14  ;;  %v399_v31 = vld [vmem:[#allocation2 + $0x8] sm:$0xff]  ;;  %v433_v61 = vadd.f32 %v425_v11, %v409_v10 }
  0xba   :  { %v407_v16 = vmul.f32 0.125, %v399_v31  ;;  %v480_v31 = vadd.f32 %v472_v1, %v456_v50 }
  0xbb   :  { %v457_v33 = vadd.f32 %v449_v18, %v433_v61  ;;  %v406_v61 = vld [vmem:[#allocation2 + $0xb0] sm:$0xff] }
  0xbc   :  { %v431_v30 = vadd.f32 %v423_v17, %v407_v16  ;;  %v451_v16 = vmul.f32 0.375, %v443_v62  ;;  %v445_v17 = vld [vmem:[#allocation2 + $0x9a] sm:$0xff]  ;;  %v422_v18 = vld [vmem:[#allocation2 + $0xb1] sm:$0xff]  ;;  %v496_v21 = vmul.f32 0.375, %v480_v31  ;;  %v414_v27 = vmul.f32 0.125, %v406_v61 }
  0xbd   :  { %330 = vrot.lane.b32.xlu0 %v276_v3, %s709_s14  ;;  %v927_v48 = vadd.f32 %v473_v29, %v457_v33  ;;  %v405_v3 = vld [vmem:[#allocation2 + $0x98] sm:$0xff]  ;;  %v453_v26 = vmul.f32 0.375, %v445_v17  ;;  %v475_v29 = vmul.f32 0.125, %v467_v19  ;;  %v953_v53 = vmul.f32 0.125, %v480_v31 }
  0xbe   :  { %326 = vrot.lane.b32.xlu1 %v274_v41, %s709_s14  ;;  %v426_v41 = vmul.f32 0.375, %v418_v28  ;;  %v455_v44 = vadd.f32 %v447_v34, %v431_v30  ;;  %v413_v12 = vmul.f32 0.125, %v405_v3  ;;  %v430_v28 = vmul.f32 0.375, %v422_v18  ;;  %v446_v33 = vld [vmem:[#allocation2 + $0xb2] sm:$0xff] }
  0xbf   :  { %v497_v5 = vmul.f32 0.375, %v927_v48  ;;  %v454_v20 = vmul.f32 0.375, %v446_v33 }
  0xc0   :  { %v434_v55 = vadd.f32 %v426_v41, %v410_v36  ;;  %v932_v59 = vadd.f32 %v471_v49, %v455_v44  ;;  %v437_v30 = vadd.f32 %v429_v13, %v413_v12  ;;  %v438_v40 = vadd.f32 %v430_v28, %v414_v27  ;;  %v470_v41 = vld [vmem:[#allocation2 + $0xb3] sm:$0xff] }
  0xc1   :  { %328 = vrot.lane.b32.xlu2 %v275_v47, %s709_s14  ;;  %v419_v47 = vld [vmem:[#allocation2 + $0x69] sm:$0xff] }
  0xc2   :  { %v427_v57 = vmul.f32 0.375, %v419_v47  ;;  %v458_v10 = vadd.f32 %v450_v2, %v434_v55  ;;  %v495_v0 = vmul.f32 0.375, %v932_v59  ;;  %v461_v38 = vadd.f32 %v453_v26, %v437_v30 }
  0xc3   :  { %v462_v46 = vadd.f32 %v454_v20, %v438_v40  ;;  %v478_v47 = vmul.f32 0.125, %v470_v41 }
  0xc4   :  { %v435_v11 = vadd.f32 %v427_v57, %v411_v56  ;;  %v482_v23 = vadd.f32 %v474_v14, %v458_v10  ;;  %v485_v45 = vadd.f32 %v477_v39, %v461_v38  ;;  %v966_v57 = vmul.f32 0.125, %v927_v48 }
  0xc5   :  { %360 = vrot.lane.b32.xlu0 %v894_v63, %s710_s15  ;;  %v486_v50 = vadd.f32 %v478_v47, %v462_v46 }
  0xc6   :  { %332 = vrot.lane.b32.xlu1 %v277_v6, %s709_s14  ;;  %v476_v6 = vmul.f32 0.125, %v468_v42  ;;  %v459_v24 = vadd.f32 %v451_v16, %v435_v11  ;;  %v498_v35 = vmul.f32 0.375, %v482_v23  ;;  %v501_v49 = vmul.f32 0.375, %v485_v45 }
  0xc7   :  { %v502_v51 = vmul.f32 0.375, %v486_v50  ;;  %v959_v42 = vmul.f32 0.125, %v932_v59  ;;  %v972_v3 = vmul.f32 0.125, %v482_v23  ;;  %v976_v59 = vmul.f32 0.125, %v486_v50 }
  0xc8   :  { %v484_v22 = vadd.f32 %v476_v6, %v460_v9  ;;  %v483_v36 = vadd.f32 %v475_v29, %v459_v24  ;;  %v984_v7 = vmul.f32 0.125, %v485_v45 }
  0xc9   :  { %358 = vrot.lane.b32.xlu2 %v900_v8, %s710_s15 }
  0xca   :  { %v500_v34 = vmul.f32 0.375, %v484_v22  ;;  %v499_v44 = vmul.f32 0.375, %v483_v36  ;;  %v963_v55 = vmul.f32 0.125, %v483_v36 }
  0xcd   :  { %366 = vrot.lane.b32.xlu0 %v904_v60, %s710_s15 }
  0xce   :  { %362 = vrot.lane.b32.xlu1 %v907_v15, %s710_s15 }
  0xd1   :  { %364 = vrot.lane.b32.xlu2 %v914_v25, %s710_s15 }
  0xd5   :  { %372 = vrot.lane.b32.xlu0 %v918_v37, %s710_s15 }
  0xd6   :  { %368 = vrot.lane.b32.xlu1 %v921_v43, %s710_s15 }
  0xd9   :  { %370 = vrot.lane.b32.xlu2 %v930_v58, %s710_s15 }
  0xdd   :  { %515 = vrot.lane.b32.xlu0 %v497_v5, %s708_s0 }
  0xde   :  { %511 = vrot.lane.b32.xlu1 %v495_v0, %s708_s0 }
  0xe1   :  { %513 = vrot.lane.b32.xlu2 %v496_v21, %s708_s0 }
  0xe5   :  { %521 = vrot.lane.b32.xlu0 %v500_v34, %s708_s0 }
  0xe6   :  { %517 = vrot.lane.b32.xlu1 %v498_v35, %s708_s0 }
  0xe9   :  { %519 = vrot.lane.b32.xlu2 %v499_v44, %s708_s0 }
  0xea   :  { %v289_v52 = vpop.permute.xlu2 %288  ;;  %v291_v1 = vpop.permute.xlu0 %290 }
  0xeb   :  { %v311_v23 = vadd.f32 %v289_v52, %v894_v63  ;;  %v312_v33 = vadd.f32 %v291_v1, %v907_v15 }
  0xed   :  { %543 = vrot.lane.b32.xlu0 %v495_v0, %s709_s14 }
  0xee   :  { %523 = vrot.lane.b32.xlu1 %v501_v49, %s708_s0 }
  0xf1   :  { %525 = vrot.lane.b32.xlu2 %v502_v51, %s708_s0 }
  0xf5   :  { %549 = vrot.lane.b32.xlu0 %v498_v35, %s709_s14 }
  0xf6   :  { %545 = vrot.lane.b32.xlu1 %v496_v21, %s709_s14 }
  0xf9   :  { %547 = vrot.lane.b32.xlu2 %v497_v5, %s709_s14  ;;  %v978_v5 = vmul.f32 0.125, %v484_v22 }
  0xfb   :  { %v295_v54 = vpop.permute.xlu2 %294 }
  0xfc   :  { %v314_v29 = vadd.f32 %v295_v54, %v904_v60 }
  0xfd   :  { %555 = vrot.lane.b32.xlu0 %v501_v49, %s709_s14 }
  0xfe   :  { %551 = vrot.lane.b32.xlu1 %v499_v44, %s709_s14 }
 0x101   :  { %553 = vrot.lane.b32.xlu2 %v500_v34, %s709_s14 }
 0x103   :  { %v287_v2 = vpop.permute.xlu1 %286 }
 0x104   :  { %v310_v10 = vadd.f32 %v287_v2, %v900_v8 }
 0x105   :  { %585 = vrot.lane.b32.xlu0 %v953_v53, %s710_s15 }
 0x106   :  { %557 = vrot.lane.b32.xlu1 %v502_v51, %s709_s14 }
 0x109   :  { %583 = vrot.lane.b32.xlu2 %v959_v42, %s710_s15 }
 0x10b   :  { %v301_v56 = vpop.permute.xlu2 %300 }
 0x10c   :  { %v317_v39 = vadd.f32 %v301_v56, %v918_v37 }
 0x10d   :  { %591 = vrot.lane.b32.xlu0 %v963_v55, %s710_s15 }
 0x10e   :  { %587 = vrot.lane.b32.xlu1 %v966_v57, %s710_s15 }
 0x110   :  { %v293_v6 = vpop.permute.xlu1 %292 }
 0x111   :  { %589 = vrot.lane.b32.xlu2 %v972_v3, %s710_s15  ;;  %v313_v16 = vadd.f32 %v293_v6, %v914_v25 }
 0x113   :  { %v323_v4 = vpop.permute.xlu2 %322 }
 0x115   :  { %597 = vrot.lane.b32.xlu0 %v976_v59, %s710_s15 }
 0x116   :  { %593 = vrot.lane.b32.xlu1 %v978_v5, %s710_s15 }
 0x117   :  { %v297_v48 = vpop.permute.xlu0 %296 }
 0x118   :  { %v315_v20 = vadd.f32 %v297_v48, %v921_v43 }
 0x119   :  { %595 = vrot.lane.b32.xlu2 %v984_v7, %s710_s15 }
 0x11b   :  { %v329_v62 = vpop.permute.xlu2 %328 }
 0x11c   :  { %v347_v60 = vadd.f32 %v329_v62, %v315_v20 }
 0x11f   :  { %v319_v31 = vpop.permute.xlu0 %318 }
 0x120   :  { %v299_v9 = vpop.permute.xlu1 %298  ;;  %v342_v11 = vadd.f32 %v319_v31, %v310_v10 }
 0x121   :  { %v316_v22 = vadd.f32 %v299_v9, %v930_v58  ;;  %v344_v58 = vadd.f32 %v323_v4, %v312_v33 }
 0x123   :  { %v359_v0 = vpop.permute.xlu2 %358 }
 0x124   :  { %v382_v12 = vadd.f32 %v359_v0, %v342_v11 }
 0x126   :  { %391 = vst.msk [vmem:[#allocation6] sm:$0xff] %vm390_vm5, %v382_v12 }
 0x127   :  { %v325_v13 = vpop.permute.xlu0 %324 }
 0x128   :  { %v321_v14 = vpop.permute.xlu1 %320  ;;  %v345_v17 = vadd.f32 %v325_v13, %v313_v16 }
 0x129   :  { %v343_v26 = vadd.f32 %v321_v14, %v311_v23 }
 0x12b   :  { %v365_v61 = vpop.permute.xlu2 %364 }
 0x12c   :  { %v385_v18 = vadd.f32 %v365_v61, %v345_v17 }
 0x12e   :  { %394 = vst.msk [vmem:[#allocation6 + $0x30] sm:$0xff] %vm390_vm5, %v385_v18 }
 0x12f   :  { %v331_v19 = vpop.permute.xlu0 %330 }
 0x130   :  { %v327_v21 = vpop.permute.xlu1 %326  ;;  %v348_v8 = vadd.f32 %v331_v19, %v316_v22 }
 0x131   :  { %v346_v34 = vadd.f32 %v327_v21, %v314_v29 }
 0x133   :  { %v371_v24 = vpop.permute.xlu2 %370 }
 0x134   :  { %v388_v30 = vadd.f32 %v371_v24, %v348_v8 }
 0x136   :  { %397 = vst.msk [vmem:[#allocation6 + $0x60] sm:$0xff] %vm390_vm5, %v388_v30 }
 0x137   :  { %v361_v27 = vpop.permute.xlu0 %360 }
 0x138   :  { %v383_v28 = vadd.f32 %v361_v27, %v343_v26  ;;  %v333_v25 = vpop.permute.xlu1 %332 }
 0x139   :  { %v349_v41 = vadd.f32 %v333_v25, %v317_v39 }
 0x13a   :  { %392 = vst.msk [vmem:[#allocation6 + $0x10] sm:$0xff] %vm390_vm5, %v383_v28 }
 0x13b   :  { %v514_v32 = vpop.permute.xlu2 %513 }
 0x13f   :  { %v367_v35 = vpop.permute.xlu0 %366 }
 0x140   :  { %v386_v36 = vadd.f32 %v367_v35, %v346_v34  ;;  %v363_v63 = vpop.permute.xlu1 %362 }
 0x141   :  { %v384_v38 = vadd.f32 %v363_v63, %v344_v58 }
 0x142   :  { %395 = vst.msk [vmem:[#allocation6 + $0x40] sm:$0xff] %vm390_vm5, %v386_v36 }
 0x143   :  { %393 = vst.msk [vmem:[#allocation6 + $0x20] sm:$0xff] %vm390_vm5, %v384_v38  ;;  %v520_v40 = vpop.permute.xlu2 %519 }
 0x144   :  { %v539_v21 = vadd.f32 %v520_v40, %v963_v55 }
 0x147   :  { %v373_v44 = vpop.permute.xlu0 %372 }
 0x148   :  { %v389_v45 = vadd.f32 %v373_v44, %v349_v41  ;;  %v369_v15 = vpop.permute.xlu1 %368 }
 0x149   :  { %v387_v46 = vadd.f32 %v369_v15, %v347_v60 }
 0x14a   :  { %398 = vst.msk [vmem:[#allocation6 + $0x70] sm:$0xff] %vm390_vm5, %v389_v45 }
 0x14b   :  { %396 = vst.msk [vmem:[#allocation6 + $0x50] sm:$0xff] %vm390_vm5, %v387_v46  ;;  %v526_v47 = vpop.permute.xlu2 %525 }
 0x14c   :  { %v542_v26 = vadd.f32 %v526_v47, %v976_v59 }
 0x14f   :  { %v516_v49 = vpop.permute.xlu0 %515 }
 0x150   :  { %v512_v50 = vpop.permute.xlu1 %511  ;;  %v537_v22 = vadd.f32 %v516_v49, %v966_v57 }
 0x151   :  { %v535_v43 = vadd.f32 %v512_v50, %v959_v42  ;;  %v536_v42 = vadd.f32 %v514_v32, %v953_v53 }
 0x153   :  { %v548_v51 = vpop.permute.xlu2 %547 }
 0x154   :  { %v569_v23 = vadd.f32 %v548_v51, %v537_v22 }
 0x157   :  { %v522_v52 = vpop.permute.xlu0 %521 }
 0x158   :  { %v518_v54 = vpop.permute.xlu1 %517  ;;  %v540_v27 = vadd.f32 %v522_v52, %v978_v5 }
 0x159   :  { %v538_v31 = vadd.f32 %v518_v54, %v972_v3 }
 0x15b   :  { %v554_v37 = vpop.permute.xlu2 %553 }
 0x15c   :  { %v572_v55 = vadd.f32 %v554_v37, %v540_v27 }
 0x15f   :  { %v544_v56 = vpop.permute.xlu0 %543 }
 0x160   :  { %v524_v1 = vpop.permute.xlu1 %523  ;;  %v567_v2 = vadd.f32 %v544_v56, %v535_v43 }
 0x161   :  { %v541_v13 = vadd.f32 %v524_v1, %v984_v7 }
 0x163   :  { %v584_v4 = vpop.permute.xlu2 %583 }
 0x164   :  { %v607_v48 = vadd.f32 %v584_v4, %v567_v2 }
 0x166   :  { %615 = vst.msk [vmem:[#allocation6 + $0x8] sm:$0xff] %vm390_vm5, %v607_v48 }
 0x167   :  { %v550_v6 = vpop.permute.xlu0 %549 }
 0x168   :  { %v546_v62 = vpop.permute.xlu1 %545  ;;  %v570_v9 = vadd.f32 %v550_v6, %v538_v31 }
 0x169   :  { %v568_v61 = vadd.f32 %v546_v62, %v536_v42 }
 0x16b   :  { %v590_v10 = vpop.permute.xlu2 %589 }
 0x16c   :  { %v610_v11 = vadd.f32 %v590_v10, %v570_v9 }
 0x16e   :  { %618 = vst.msk [vmem:[#allocation6 + $0x38] sm:$0xff] %vm390_vm5, %v610_v11 }
 0x16f   :  { %v556_v0 = vpop.permute.xlu0 %555 }
 0x170   :  { %v552_v12 = vpop.permute.xlu1 %551  ;;  %v573_v14 = vadd.f32 %v556_v0, %v541_v13 }
 0x171   :  { %v571_v8 = vadd.f32 %v552_v12, %v539_v21 }
 0x173   :  { %v596_v16 = vpop.permute.xlu2 %595 }
 0x174   :  { %v613_v17 = vadd.f32 %v596_v16, %v573_v14 }
 0x176   :  { %621 = vst.msk [vmem:[#allocation6 + $0x68] sm:$0xff] %vm390_vm5, %v613_v17 }
 0x177   :  { %v586_v18 = vpop.permute.xlu0 %585 }
 0x178   :  { %v608_v19 = vadd.f32 %v586_v18, %v568_v61  ;;  %v558_v3 = vpop.permute.xlu1 %557 }
 0x179   :  { %v574_v28 = vadd.f32 %v558_v3, %v542_v26 }
 0x17a   :  { %616 = vst.msk [vmem:[#allocation6 + $0x18] sm:$0xff] %vm390_vm5, %v608_v19 }
 0x17f   :  { %v592_v7 = vpop.permute.xlu0 %591 }
 0x180   :  { %v611_v24 = vadd.f32 %v592_v7, %v571_v8  ;;  %v588_v30 = vpop.permute.xlu1 %587 }
 0x181   :  { %v609_v53 = vadd.f32 %v588_v30, %v569_v23 }
 0x182   :  { %619 = vst.msk [vmem:[#allocation6 + $0x48] sm:$0xff] %vm390_vm5, %v611_v24 }
 0x183   :  { %617 = vst.msk [vmem:[#allocation6 + $0x28] sm:$0xff] %vm390_vm5, %v609_v53 }
 0x187   :  { %v598_v57 = vpop.permute.xlu0 %597 }
 0x188   :  { %v614_v25 = vadd.f32 %v598_v57, %v574_v28  ;;  %v594_v29 = vpop.permute.xlu1 %593 }
 0x189   :  { %v612_v32 = vadd.f32 %v594_v29, %v572_v55 }
 0x18a   :  { %622 = vst.msk [vmem:[#allocation6 + $0x78] sm:$0xff] %vm390_vm5, %v614_v25 }
 0x18b   :  { %620 = vst.msk [vmem:[#allocation6 + $0x58] sm:$0xff] %vm390_vm5, %v612_v32 }
 0x18c   :  { %635 = dma.vmem_to_hbm [thread:$0]  %s628_s17, 2048, %s630_s20, [#allocation5], %s704_s11, %s704_s11, %s705_s12  }
 0x18d   :  { %701 = dma.done.wait [#allocation5], 2048  }
 0x18e   :  { %702 = vsyncadd [#allocation5], 4294965248 }
 0x18f   :  { %640 = vsyncpa [#allocation4], 1 }
 0x190   :  { %641 = vsyncpa [#allocation5], 1 }

</bundles_post_ra>
